<compile_context>
chip_gen: v6e
topology: v6e:2x2x1
jax: 0.10.0
libtpu: 0.0.40
codegen_flags: <defaults>
</compile_context>

<pallas_src>
import math
import functools

import jax
import jax.numpy as jnp
from jax.experimental import pallas as pl
from jax.experimental.pallas import tpu as pltpu


def _round_up(x, m):
    return ((x + m - 1) // m) * m


def _mdlstm_kernel(x1_ref, x2_ref, h1_ref, h2_ref, c1_ref, c2_ref,
                   w_ref, b_ref, hc_ref, *, hidden_size):
    """One fused MDLSTM step on a (TB, .) block of tree nodes.

    gates = [x1 | x2 | h1 | h2] @ W_fused + b_fused
    W_fused columns: [ingate | cellgate | outgate | f1 | f2]  (each H wide).
    Single K = 2I+2H MXU push per node block, f32 accumulation.
    """
    H = hidden_size
    cdt = w_ref.dtype  # MXU input dtype (bf16 by default)

    # In-kernel lane concat (replaces per-step XLA concat + HBM materialization
    # in the wrapper), then one cast to the MXU input dtype.
    x_cat = jnp.concatenate(
        [x1_ref[...], x2_ref[...], h1_ref[...], h2_ref[...]], axis=1
    ).astype(cdt)

    gates = jnp.dot(x_cat, w_ref[...], preferred_element_type=jnp.float32)
    gates = gates + b_ref[...].astype(jnp.float32)

    # Epilogue stays f32 on every generation (v5e VPU/EUP have no bf16).
    ingate = jax.nn.sigmoid(gates[:, 0 * H:1 * H])
    cellgate = jnp.tanh(gates[:, 1 * H:2 * H])
    outgate = jax.nn.sigmoid(gates[:, 2 * H:3 * H])
    f1 = jax.nn.sigmoid(gates[:, 3 * H:4 * H])
    f2 = jax.nn.sigmoid(gates[:, 4 * H:5 * H])

    c1 = c1_ref[...].astype(jnp.float32)
    c2 = c2_ref[...].astype(jnp.float32)
    next_c = f1 * c1 + f2 * c2 + ingate * cellgate
    next_h = outgate * jnp.tanh(next_c)

    # Merged output: [next_h | next_c] -> one (TB, 2H) store / one DMA stream.
    hc_ref[...] = jnp.concatenate([next_h, next_c], axis=1).astype(hc_ref.dtype)


def prepare_mdlstm_params(params, input_size, hidden_size,
                          weight_dtype=jnp.bfloat16):
    """Build the fused, pre-transposed weight ONCE (hoisted out of the step).

    Torch-layout params:
      weight_H  (3H, 2I+2H), bias_H (3H,)
      weight_f1 (H,  I+H),   bias_f1 (H,)
      weight_f2 (H,  I+H),   bias_f2 (H,)

    Returns an arrays-only dict (safe to pass through jax.jit):
      w_fused (2I+2H, 5H): columns = [gates(3H) | f1(H) | f2(H)],
        rows ordered as x_cat = [x1 | x2 | h1 | h2].  The f1 column block has
        zero rows opposite x2/h2; the f2 block has zero rows opposite x1/h1,
        so the forget gates never mix streams (matches torch concat exactly).
      b_fused (1, 5H) in f32 (bias / epilogue stay full precision).
    """
    I, H = input_size, hidden_size
    f32 = jnp.float32

    wH_T = jnp.asarray(params["weight_H"]).T.astype(f32)     # (2I+2H, 3H)
    wf1_T = jnp.asarray(params["weight_f1"]).T.astype(f32)   # (I+H, H)
    wf2_T = jnp.asarray(params["weight_f2"]).T.astype(f32)   # (I+H, H)

    zI = jnp.zeros((I, H), f32)
    zH = jnp.zeros((H, H), f32)
    # rows: [x1 (I), x2 (I), h1 (H), h2 (H)]
    col_f1 = jnp.concatenate([wf1_T[:I], zI, wf1_T[I:], zH], axis=0)
    col_f2 = jnp.concatenate([zI, wf2_T[:I], zH, wf2_T[I:]], axis=0)

    w_fused = jnp.concatenate([wH_T, col_f1, col_f2], axis=1)  # (2I+2H, 5H)
    b_fused = jnp.concatenate([
        jnp.asarray(params["bias_H"]).astype(f32),
        jnp.asarray(params["bias_f1"]).astype(f32),
        jnp.asarray(params["bias_f2"]).astype(f32),
    ]).reshape(1, 5 * H)

    return {"w_fused": w_fused.astype(weight_dtype), "b_fused": b_fused}


def make_show_tell_tree_core_forward(input_size, hidden_size, *, node_block=256):
    """Factory closing over static sizes (fixes the jit tracer issue).

    Returns forward(fused_params, p_xt, s_xt, p_state, s_state, ...) matching
    ShowTellTreeCore.forward semantics.  The batch axis is the "node" axis of
    a tree level: stack many nodes to fill MXU rows; blocks of `node_block`
    rows are pipelined over a parallel grid with VMEM-resident weights.
    """
    I, H = input_size, hidden_size
    K = 2 * I + 2 * H
    N = 5 * H
    assert node_block % 8 == 0, "node_block must be a multiple of 8 (sublanes)"

    kernel = functools.partial(_mdlstm_kernel, hidden_size=H)

    @jax.jit
    def step(w_fused, b_fused, x1, x2, h1, c1, h2, c2):
        B = x1.shape[0]
        if B <= node_block:
            # Single grid step; block == full array extent (no padding needed).
            TB, PB = B, B
        else:
            TB = node_block
            PB = _round_up(B, TB)

        def pad(a):
            return a if PB == B else jnp.pad(a, ((0, PB - B), (0, 0)))

        x1p, x2p, h1p, h2p, c1p, c2p = map(pad, (x1, x2, h1, h2, c1, c2))

        node_map = lambda i: (i, 0)
        const_map = lambda i: (0, 0)   # weights: DMA'd once, VMEM-resident

        hc = pl.pallas_call(
            kernel,
            out_shape=jax.ShapeDtypeStruct((PB, 2 * H), jnp.float32),
            grid=(PB // TB,),
            in_specs=[
                pl.BlockSpec((TB, I), node_map),   # x1
                pl.BlockSpec((TB, I), node_map),   # x2
                pl.BlockSpec((TB, H), node_map),   # h1
                pl.BlockSpec((TB, H), node_map),   # h2
                pl.BlockSpec((TB, H), node_map),   # c1
                pl.BlockSpec((TB, H), node_map),   # c2
                pl.BlockSpec((K, N), const_map),   # w_fused
                pl.BlockSpec((1, N), const_map),   # b_fused
            ],
            out_specs=pl.BlockSpec((TB, 2 * H), node_map),
            compiler_params=pltpu.CompilerParams(
                dimension_semantics=("parallel",),  # both TCs on v7x
            ),
        )(x1p, x2p, h1p, h2p, c1p, c2p, w_fused, b_fused)

        next_h = hc[:B, :H]
        next_c = hc[:B, H:]
        return next_h, next_c

    def forward(fused_params, p_xt, s_xt, p_state, s_state,
                fc_feats=None, att_feats=None, p_att_feats=None,
                att_masks=None):
        # ShowTellTreeCore.forward ignores fc_feats/att_feats/p_att_feats/att_masks.
        h1, c1 = p_state
        h2, c2 = s_state
        next_h, next_c = step(fused_params["w_fused"], fused_params["b_fused"],
                              p_xt, s_xt, h1, c1, h2, c2)
        output = next_h
        return output, (next_h, next_c)

    return forward


def _reference_forward(params, x1, x2, state1, state2):
    """Plain-JAX (f32) reference mirroring the torch MDLSTMCell math."""
    h1, c1 = state1
    h2, c2 = state2
    Hcat = jnp.concatenate([x1, x2, h1, h2], axis=1)
    gates = Hcat @ params["weight_H"].T + params["bias_H"]
    hid = h1.shape[1]
    ingate = jax.nn.sigmoid(gates[:, :hid])
    cellgate = jnp.tanh(gates[:, hid:2 * hid])
    outgate = jax.nn.sigmoid(gates[:, 2 * hid:])
    f1 = jax.nn.sigmoid(
        jnp.concatenate([x1, h1], axis=1) @ params["weight_f1"].T + params["bias_f1"])
    f2 = jax.nn.sigmoid(
        jnp.concatenate([x2, h2], axis=1) @ params["weight_f2"].T + params["bias_f2"])
    next_c = f1 * c1 + f2 * c2 + ingate * cellgate
    next_h = outgate * jnp.tanh(next_c)
    return next_h, (next_h, next_c)


if __name__ == "__main__":
    # Shapes consistent with the module:
    #   opt.input_encoding_size = 32, opt.rnn_size = 32, batch (nodes) = 2.
    B, I, H = 2, 32, 32
    key = jax.random.PRNGKey(0)
    keys = jax.random.split(key, 16)

    stdv = 1.0 / math.sqrt(H)
    uni = lambda k, shape: jax.random.uniform(k, shape, jnp.float32, -stdv, stdv)

    params = {
        "weight_f1": uni(keys[0], (H, I + H)),
        "weight_f2": uni(keys[1], (H, I + H)),
        "weight_H": uni(keys[2], (3 * H, 2 * I + 2 * H)),
        "bias_f1": uni(keys[3], (H,)),
        "bias_f2": uni(keys[4], (H,)),
        "bias_H": uni(keys[5], (3 * H,)),
    }

    # Fuse / transpose weights ONCE (bf16 by default -> half the weight DMA).
    fused_params = prepare_mdlstm_params(params, input_size=I, hidden_size=H)
    jax.block_until_ready(fused_params["w_fused"])

    forward = make_show_tell_tree_core_forward(I, H, node_block=256)

    # bf16 weights / bf16 MXU inputs with f32 accumulation -> loosened tolerance.
    ATOL = RTOL = 5e-2

    p_xt = jax.random.normal(keys[6], (B, I), jnp.float32)
    s_xt = jax.random.normal(keys[7], (B, I), jnp.float32)
    p_state = (jax.random.normal(keys[8], (B, H), jnp.float32),
               jax.random.normal(keys[9], (B, H), jnp.float32))
    s_state = (jax.random.normal(keys[10], (B, H), jnp.float32),
               jax.random.normal(keys[11], (B, H), jnp.float32))

    # Step 1.
    output, state = forward(fused_params, p_xt, s_xt, p_state, s_state,
                            None, None, None, None)
    jax.block_until_ready((output, state))

    ref_out, (ref_h, ref_c) = _reference_forward(params, p_xt, s_xt, p_state, s_state)
    assert jnp.allclose(output, ref_out, atol=ATOL, rtol=RTOL)
    assert jnp.allclose(state[0], ref_h, atol=ATOL, rtol=RTOL)
    assert jnp.allclose(state[1], ref_c, atol=ATOL, rtol=RTOL)

    # Step 2: feed the new state back in (recurrent reuse of cached fused
    # weights — no weight re-transpose / re-fusion per step).
    output2, state2 = forward(fused_params, p_xt, s_xt, state, state,
                              None, None, None, None)
    jax.block_until_ready((output2, state2))

    ref_out2, (ref_h2, ref_c2) = _reference_forward(
        params, p_xt, s_xt, (ref_h, ref_c), (ref_h, ref_c))
    assert jnp.allclose(output2, ref_out2, atol=ATOL, rtol=RTOL)
    assert jnp.allclose(state2[1], ref_c2, atol=ATOL, rtol=RTOL)

    # Amortized tree-level path: 300 nodes stacked on the node axis -> padded
    # to 512, grid=(2,) with 256-row blocks, weights DMA'd once, parallel axis.
    NB = 300
    lk = jax.random.split(keys[12], 6)
    lp_xt = jax.random.normal(lk[0], (NB, I), jnp.float32)
    ls_xt = jax.random.normal(lk[1], (NB, I), jnp.float32)
    lp_state = (jax.random.normal(lk[2], (NB, H), jnp.float32),
                jax.random.normal(lk[3], (NB, H), jnp.float32))
    ls_state = (jax.random.normal(lk[4], (NB, H), jnp.float32),
                jax.random.normal(lk[5], (NB, H), jnp.float32))

    l_out, l_state = forward(fused_params, lp_xt, ls_xt, lp_state, ls_state,
                             None, None, None, None)
    jax.block_until_ready((l_out, l_state))

    lref_out, (lref_h, lref_c) = _reference_forward(
        params, lp_xt, ls_xt, lp_state, ls_state)
    assert l_out.shape == (NB, H) and l_state[1].shape == (NB, H)
    assert jnp.allclose(l_out, lref_out, atol=ATOL, rtol=RTOL)
    assert jnp.allclose(l_state[1], lref_c, atol=ATOL, rtol=RTOL)

    print("KERNEL_OK")
</pallas_src>

<mosaic_0001>
module attributes {stable_mosaic.version = 11 : i64} {
  func.func @_mdlstm_kernel(%arg0: i32, %arg1: memref<2x32xf32, #tpu.memory_space<vmem>>, %arg2: memref<2x32xf32, #tpu.memory_space<vmem>>, %arg3: memref<2x32xf32, #tpu.memory_space<vmem>>, %arg4: memref<2x32xf32, #tpu.memory_space<vmem>>, %arg5: memref<2x32xf32, #tpu.memory_space<vmem>>, %arg6: memref<2x32xf32, #tpu.memory_space<vmem>>, %arg7: memref<128x160xbf16, #tpu.memory_space<vmem>>, %arg8: memref<1x160xf32, #tpu.memory_space<vmem>>, %arg9: memref<2x64xf32, #tpu.memory_space<vmem>>) attributes {dimension_semantics = [#tpu.dimension_semantics<parallel>], iteration_bounds = array<i64: 1>, scalar_prefetch = 0 : i64, scratch_operands = 0 : i64, tpu.core_type = #tpu.core_type<tc>, window_params = [{transform_indices = @transform_0, window_bounds = array<i64: 2, 32>}, {transform_indices = @transform_1, window_bounds = array<i64: 2, 32>}, {transform_indices = @transform_2, window_bounds = array<i64: 2, 32>}, {transform_indices = @transform_3, window_bounds = array<i64: 2, 32>}, {transform_indices = @transform_4, window_bounds = array<i64: 2, 32>}, {transform_indices = @transform_5, window_bounds = array<i64: 2, 32>}, {pipeline_mode = #tpu.pipeline_mode<synchronous>, transform_indices = @transform_6, window_bounds = array<i64: 128, 160>}, {pipeline_mode = #tpu.pipeline_mode<synchronous>, transform_indices = @transform_7, window_bounds = array<i64: 1, 160>}, {transform_indices = @transform_8, window_bounds = array<i64: 2, 64>}]} {
    %c0 = arith.constant 0 : index
    %c0_0 = arith.constant 0 : index
    %0 = vector.load %arg1[%c0, %c0_0] : memref<2x32xf32, #tpu.memory_space<vmem>>, vector<2x32xf32>
    %c0_1 = arith.constant 0 : index
    %c0_2 = arith.constant 0 : index
    %1 = vector.load %arg2[%c0_1, %c0_2] : memref<2x32xf32, #tpu.memory_space<vmem>>, vector<2x32xf32>
    %c0_3 = arith.constant 0 : index
    %c0_4 = arith.constant 0 : index
    %2 = vector.load %arg3[%c0_3, %c0_4] : memref<2x32xf32, #tpu.memory_space<vmem>>, vector<2x32xf32>
    %c0_5 = arith.constant 0 : index
    %c0_6 = arith.constant 0 : index
    %3 = vector.load %arg4[%c0_5, %c0_6] : memref<2x32xf32, #tpu.memory_space<vmem>>, vector<2x32xf32>
    %4 = tpu.concatenate %0, %1, %2, %3 in 1 : vector<2x32xf32>, vector<2x32xf32>, vector<2x32xf32>, vector<2x32xf32> -> vector<2x128xf32>
    %5 = arith.truncf %4 : vector<2x128xf32> to vector<2x128xbf16>
    %c0_7 = arith.constant 0 : index
    %c0_8 = arith.constant 0 : index
    %6 = vector.load %arg7[%c0_7, %c0_8] : memref<128x160xbf16, #tpu.memory_space<vmem>>, vector<128x160xbf16>
    %cst = arith.constant dense<0.000000e+00> : vector<2x160xf32>
    %7 = tpu.matmul %5, %6, %cst {dimension_numbers = #tpu.dot_dimension_numbers<[1], [0], [0], [1], [0, 0, 1, 1], [], []>} : vector<2x128xbf16>, vector<128x160xbf16>, vector<2x160xf32> -> vector<2x160xf32>
    %c0_9 = arith.constant 0 : index
    %c0_10 = arith.constant 0 : index
    %8 = vector.load %arg8[%c0_9, %c0_10] : memref<1x160xf32, #tpu.memory_space<vmem>>, vector<1x160xf32>
    %9 = vector.broadcast %8 : vector<1x160xf32> to vector<2x160xf32>
    %10 = arith.addf %7, %9 : vector<2x160xf32>
    %11 = vector.extract_strided_slice %10 {offsets = [0, 0], sizes = [2, 32], strides = [1, 1]} : vector<2x160xf32> to vector<2x32xf32>
    %12 = arith.negf %11 : vector<2x32xf32>
    %13 = math.exp %12 : vector<2x32xf32>
    %cst_11 = arith.constant 1.000000e+00 : f32
    %14 = vector.broadcast %cst_11 : f32 to vector<2x32xf32>
    %15 = arith.addf %14, %13 : vector<2x32xf32>
    %16 = arith.divf %14, %15 : vector<2x32xf32>
    %17 = vector.extract_strided_slice %10 {offsets = [0, 32], sizes = [2, 32], strides = [1, 1]} : vector<2x160xf32> to vector<2x32xf32>
    %18 = math.tanh %17 : vector<2x32xf32>
    %19 = vector.extract_strided_slice %10 {offsets = [0, 64], sizes = [2, 32], strides = [1, 1]} : vector<2x160xf32> to vector<2x32xf32>
    %20 = arith.negf %19 : vector<2x32xf32>
    %21 = math.exp %20 : vector<2x32xf32>
    %cst_12 = arith.constant 1.000000e+00 : f32
    %22 = vector.broadcast %cst_12 : f32 to vector<2x32xf32>
    %23 = arith.addf %22, %21 : vector<2x32xf32>
    %24 = arith.divf %22, %23 : vector<2x32xf32>
    %25 = vector.extract_strided_slice %10 {offsets = [0, 96], sizes = [2, 32], strides = [1, 1]} : vector<2x160xf32> to vector<2x32xf32>
    %26 = arith.negf %25 : vector<2x32xf32>
    %27 = math.exp %26 : vector<2x32xf32>
    %cst_13 = arith.constant 1.000000e+00 : f32
    %28 = vector.broadcast %cst_13 : f32 to vector<2x32xf32>
    %29 = arith.addf %28, %27 : vector<2x32xf32>
    %30 = arith.divf %28, %29 : vector<2x32xf32>
    %31 = vector.extract_strided_slice %10 {offsets = [0, 128], sizes = [2, 32], strides = [1, 1]} : vector<2x160xf32> to vector<2x32xf32>
    %32 = arith.negf %31 : vector<2x32xf32>
    %33 = math.exp %32 : vector<2x32xf32>
    %cst_14 = arith.constant 1.000000e+00 : f32
    %34 = vector.broadcast %cst_14 : f32 to vector<2x32xf32>
    %35 = arith.addf %34, %33 : vector<2x32xf32>
    %36 = arith.divf %34, %35 : vector<2x32xf32>
    %c0_15 = arith.constant 0 : index
    %c0_16 = arith.constant 0 : index
    %37 = vector.load %arg5[%c0_15, %c0_16] : memref<2x32xf32, #tpu.memory_space<vmem>>, vector<2x32xf32>
    %c0_17 = arith.constant 0 : index
    %c0_18 = arith.constant 0 : index
    %38 = vector.load %arg6[%c0_17, %c0_18] : memref<2x32xf32, #tpu.memory_space<vmem>>, vector<2x32xf32>
    %39 = arith.mulf %30, %37 : vector<2x32xf32>
    %40 = arith.mulf %36, %38 : vector<2x32xf32>
    %41 = arith.addf %39, %40 : vector<2x32xf32>
    %42 = arith.mulf %16, %18 : vector<2x32xf32>
    %43 = arith.addf %41, %42 : vector<2x32xf32>
    %44 = math.tanh %43 : vector<2x32xf32>
    %45 = arith.mulf %24, %44 : vector<2x32xf32>
    %46 = tpu.concatenate %45, %43 in 1 : vector<2x32xf32>, vector<2x32xf32> -> vector<2x64xf32>
    %c0_19 = arith.constant 0 : index
    %c0_20 = arith.constant 0 : index
    %47 = vector.load %arg9[%c0_19, %c0_20] : memref<2x64xf32, #tpu.memory_space<vmem>>, vector<2x64xf32>
    tpu.vector_store %arg9[%c0_19, %c0_20], %46 {strides = array<i32>} : memref<2x64xf32, #tpu.memory_space<vmem>>, vector<2x64xf32>,
    return
  }
  func.func @transform_0(%arg0: i32) -> (i32, i32) {
    %c0_i32 = arith.constant 0 : i32
    %c0_i32_0 = arith.constant 0 : i32
    return %arg0, %c0_i32 : i32, i32
  }
  func.func @transform_1(%arg0: i32) -> (i32, i32) {
    %c0_i32 = arith.constant 0 : i32
    %c0_i32_0 = arith.constant 0 : i32
    return %arg0, %c0_i32 : i32, i32
  }
  func.func @transform_2(%arg0: i32) -> (i32, i32) {
    %c0_i32 = arith.constant 0 : i32
    %c0_i32_0 = arith.constant 0 : i32
    return %arg0, %c0_i32 : i32, i32
  }
  func.func @transform_3(%arg0: i32) -> (i32, i32) {
    %c0_i32 = arith.constant 0 : i32
    %c0_i32_0 = arith.constant 0 : i32
    return %arg0, %c0_i32 : i32, i32
  }
  func.func @transform_4(%arg0: i32) -> (i32, i32) {
    %c0_i32 = arith.constant 0 : i32
    %c0_i32_0 = arith.constant 0 : i32
    return %arg0, %c0_i32 : i32, i32
  }
  func.func @transform_5(%arg0: i32) -> (i32, i32) {
    %c0_i32 = arith.constant 0 : i32
    %c0_i32_0 = arith.constant 0 : i32
    return %arg0, %c0_i32 : i32, i32
  }
  func.func @transform_6(%arg0: i32) -> (i32, i32) {
    %c0_i32 = arith.constant 0 : i32
    %c0_i32_0 = arith.constant 0 : i32
    %c0_i32_1 = arith.constant 0 : i32
    return %c0_i32, %c0_i32_0 : i32, i32
  }
  func.func @transform_7(%arg0: i32) -> (i32, i32) {
    %c0_i32 = arith.constant 0 : i32
    %c0_i32_0 = arith.constant 0 : i32
    %c0_i32_1 = arith.constant 0 : i32
    return %c0_i32, %c0_i32_0 : i32, i32
  }
  func.func @transform_8(%arg0: i32) -> (i32, i32) {
    %c0_i32 = arith.constant 0 : i32
    %c0_i32_0 = arith.constant 0 : i32
    return %arg0, %c0_i32 : i32, i32
  }
}

</mosaic_0001>

<bundles_post_ra>
// kernel: step.1
= control target key start
LH: loop header
LB: loop body
LE: loop exit
PB: predicated region body
PF: predicated region fallthrough
CT: control target
= control target key end

     0   :  { %v317_v3 = vmov 0   ;;  %s318_s11 = smov 32   ;;  %s319_s14 = smov 96   ;;  %vm46_vm0 = vcmask 261120   ;;  %vm48_vm1 = vcmask 523264   ;;  %vm50_vm2 = vcmask 785408   ;;  %s449_s1 = inlined_call_operand.vmem [shape: f32[2,32], index: 1, kind: input, shape index: {}]   ;;  %s450_s2 = inlined_call_operand.vmem [shape: f32[2,32], index: 2, kind: input, shape index: {}]   ;;  %s451_s3 = inlined_call_operand.vmem [shape: f32[2,32], index: 3, kind: input, shape index: {}]   ;;  %s452_s6 = inlined_call_operand.vmem [shape: bf16[128,160], index: 6, kind: input, shape index: {}]   ;;  %s453_s4 = inlined_call_operand.vmem [shape: f32[2,32], index: 4, kind: input, shape index: {}]   ;;  %s454_s0 = inlined_call_operand.vmem [shape: f32[2,32], index: 0, kind: input, shape index: {}]   ;;  %s455_s7 = inlined_call_operand.vmem [shape: f32[1,160], index: 7, kind: input, shape index: {}]   ;;  %s456_s5 = inlined_call_operand.vmem [shape: f32[2,32], index: 5, kind: input, shape index: {}]   ;;  %s457_s8 = inlined_call_operand.vmem [shape: f32[2,64], index: 8, kind: output, shape index: {}]  }
   0x1   :  { %v31_v0 = vld [vmem:[%s449_s1] sm:$0x3]  ;;  %193 = vmatprep.mubr.bf16.mxu0 %v317_v3  ;;  %v281_v4 = vld [vmem:[%s452_s6 + $0x74] ss:$8 sps:$4 sm:$0xff]   ;;  %v283_v5 = vld [vmem:[%s452_s6 + $0x70] ss:$8 sps:$4 sm:$0xff]   ;;  %v71_v29 = vlaneseq }
   0x2   :  { %v32_v1 = vld [vmem:[%s450_s2] sm:$0x3]  ;;  %35 = vrot.lane.b32.xlu0 %v31_v0, %s318_s11  ;;  %161 = vmatprep.subr.bf16.mxu0 %v281_v4  ;;  %v284_v6 = vld [vmem:[%s452_s6 + $0x64] ss:$8 sps:$4 sm:$0xff]   ;;  %s320_s18 = smov 64   ;;  %vm253_vm3 = vcmask 517120  }
   0x3   :  { %v33_v2 = vld [vmem:[%s451_s3] sm:$0x3]  ;;  %162 = vmatpush1.bf16.msra.mxu0 %v283_v5  ;;  %v287_v8 = vld [vmem:[%s452_s6 + $0x54] ss:$8 sps:$4 sm:$0xff]   ;;  %v289_v9 = vld [vmem:[%s452_s6 + $0x50] ss:$8 sps:$4 sm:$0xff]  }
   0x4   :  { %43 = vrot.lane.b32.xlu1 %v33_v2, %s319_s14  ;;  %v286_v7 = vld [vmem:[%s452_s6 + $0x60] ss:$8 sps:$4 sm:$0xff]   ;;  %163 = vmatprep.subr.bf16.mxu0 %v284_v6  ;;  %v290_v10 = vld [vmem:[%s452_s6 + $0x44] ss:$8 sps:$4 sm:$0xff]   ;;  %v293_v13 = vld [vmem:[%s452_s6 + $0x34] ss:$8 sps:$4 sm:$0xff]  }
   0x5   :  { %v292_v11 = vld [vmem:[%s452_s6 + $0x40] ss:$8 sps:$4 sm:$0xff]   ;;  %v295_v14 = vld [vmem:[%s452_s6 + $0x30] ss:$8 sps:$4 sm:$0xff]   ;;  %v296_v15 = vld [vmem:[%s452_s6 + $0x24] ss:$8 sps:$4 sm:$0xff]  }
   0x6   :  { %39 = vrot.lane.b32.xlu0 %v32_v1, %s320_s18  ;;  %v215_v12 = vld [vmem:[%s453_s4] sm:$0x3]  ;;  %v299_v17 = vld [vmem:[%s452_s6 + $0x14] ss:$8 sps:$4 sm:$0xff]   ;;  %v301_v18 = vld [vmem:[%s452_s6 + $0x10] ss:$8 sps:$4 sm:$0xff]  }
   0x7   :  { %164 = vmatpush1.bf16.msra.mxu0 %v286_v7  ;;  %v298_v16 = vld [vmem:[%s452_s6 + $0x20] ss:$8 sps:$4 sm:$0xff]   ;;  %v302_v19 = vld [vmem:[%s452_s6 + $0x4] ss:$8 sps:$4 sm:$0xff]   ;;  %v72_v30 = vshrl.u32 %v71_v29, 7 }
   0x8   :  { %165 = vmatprep.subr.bf16.mxu0 %v287_v8  ;;  %v304_v20 = vld [vmem:[%s452_s6] ss:$8 sps:$4 sm:$0xff]  }
   0x9   :  { %v30_v22 = vld [vmem:[%s454_s0] sm:$0x3]  ;;  %v73_v31 = vsub.s32 0, %v72_v30  ;;  %v77_v33 = vsub.s32 1, %v72_v30 }
   0xa   :  { %218 = vrot.lane.b32.xlu0 %v215_v12, %s319_s14  ;;  %v69_v32 = vld [vmem:[%s455_s7] sm:$0x3] }
   0xb   :  { %166 = vmatpush1.bf16.msra.mxu0 %v289_v9  ;;  %v74_v34 = vrot.slane %v69_v32, %v73_v31  ;;  %v78_v35 = vrot.slane %v69_v32, %v77_v33  ;;  %v216_v46 = vld [vmem:[%s456_s5] sm:$0x3] }
   0xc   :  { %167 = vmatprep.subr.bf16.mxu0 %v290_v10 }
   0xf   :  { %168 = vmatpush1.bf16.msra.mxu0 %v292_v11 }
  0x10   :  { %169 = vmatprep.subr.bf16.mxu0 %v293_v13 }
  0x13   :  { %170 = vmatpush1.bf16.msra.mxu0 %v295_v14 }
  0x14   :  { %171 = vmatprep.subr.bf16.mxu0 %v296_v15 }
  0x17   :  { %172 = vmatpush1.bf16.msra.mxu0 %v298_v16 }
  0x18   :  { %173 = vmatprep.subr.bf16.mxu0 %v299_v17 }
  0x1b   :  { %174 = vmatpush1.bf16.msra.mxu0 %v301_v18 }
  0x1c   :  { %175 = vmatprep.subr.bf16.mxu0 %v302_v19 }
  0x1f   :  { %176 = vmatpush1.bf16.msra.mxu0 %v304_v20 }
  0x74   :  { %v36_v21 = vpop.permute.xlu0 %35 }
  0x75   :  { %v47_v24 = vsel %vm46_vm0, %v30_v22, %v36_v21 }
  0x76   :  { %v44_v23 = vpop.permute.xlu1 %43 }
  0x78   :  { %v40_v25 = vpop.permute.xlu0 %39 }
  0x79   :  { %v49_v26 = vsel %vm48_vm1, %v47_v24, %v40_v25 }
  0x7a   :  { %v51_v27 = vsel %vm50_vm2, %v49_v26, %v44_v23 }
  0x7b   :  { %v52_v28 = vpack.c.bf16 %v51_v27, %v51_v27 }
  0x7c   :  { %v219_v55 = vpop.permute.xlu0 %218 }
  0x7d   :  { %194 = vmatmul.mubr.bf16.vlgmr.msra.gmra.mxu0 %v52_v28 }
 0x13d   :  { %v195_v36 = vpop.f32.mrf.mxu0 }
 0x13e   :  { %v196_v37 = vadd.f32 %v195_v36, %v74_v34 }
 0x13f   :  { %v197_v38 = vpop.f32.mrf.mxu0 }
 0x140   :  { %305 = vtanh.f32 %v196_v37  ;;  %v198_v39 = vadd.f32 %v197_v38, %v78_v35  ;;  %v275_v49 = vmul.f32 -1.442695, %v196_v37 }
 0x141   :  { %v199_v40 = vpop.f32.mrf.mxu0 }
 0x142   :  { %v276_v41 = vmul.f32 -1.442695, %v198_v39 }
 0x143   :  { %v200_v42 = vpop.f32.mrf.mxu0 }
 0x144   :  { %307 = vpow2.f32 %v276_v41 }
 0x14d   :  { %v306_v43 = vpop.eup %305 }
 0x14e   :  { %229 = vrot.lane.b32.xlu1 %v306_v43, %s319_s14 }
 0x151   :  { %v308_v44 = vpop.eup %307 }
 0x152   :  { %v212_v45 = vadd.f32 1.0, %v308_v44 }
 0x154   :  { %309 = vrcp.f32 %v212_v45 }
 0x155   :  { %311 = vpow2.f32 %v275_v49 }
 0x161   :  { %v310_v47 = vpop.eup %309 }
 0x162   :  { %v222_v48 = vmul.f32 %v310_v47, %v216_v46  ;;  %v312_v50 = vpop.eup %311 }
 0x163   :  { %v205_v51 = vadd.f32 1.0, %v312_v50 }
 0x164   :  { %224 = vrot.lane.b32.xlu1 %v222_v48, %s319_s14 }
 0x165   :  { %313 = vrcp.f32 %v205_v51 }
 0x172   :  { %v314_v52 = vpop.eup %313 }
 0x173   :  { %v221_v57 = vmul.f32 %v314_v52, %v219_v55 }
 0x1c0   :  { %v230_v53 = vpop.permute.xlu1 %229 }
 0x1c1   :  { %v232_v54 = vmul.f32 %v314_v52, %v230_v53 }
 0x1c3   :  { %234 = vrot.lane.b32.xlu0 %v232_v54, %s319_s14 }
 0x1d6   :  { %v225_v56 = vpop.permute.xlu1 %224 }
 0x1d7   :  { %v227_v58 = vadd.f32 %v225_v56, %v221_v57 }
 0x235   :  { %v235_v59 = vpop.permute.xlu0 %234 }
 0x236   :  { %v237_v60 = vadd.f32 %v235_v59, %v227_v58 }
 0x238   :  { %315 = vtanh.f32 %v237_v60 }
 0x245   :  { %v316_v61 = vpop.eup %315 }
 0x246   :  { %240 = vrot.lane.b32.xlu1 %v316_v61, %s319_s14 }
 0x24a   :  { %249 = vrot.lane.b32.xlu1 %v237_v60, %s320_s18 }
 0x2b8   :  { %v241_v62 = vpop.permute.xlu1 %240 }
 0x2b9   :  { %v243_v63 = vmul.f32 %v314_v52, %v241_v62 }
 0x2bb   :  { %245 = vrot.lane.b32.xlu0 %v243_v63, %s320_s18 }
 0x2bc   :  { %v250_v0 = vpop.permute.xlu1 %249 }
 0x32d   :  { %v246_v1 = vpop.permute.xlu0 %245 }
 0x32e   :  { %v252_v2 = vsel %vm46_vm0, %v246_v1, %v250_v0 }
 0x32f   :  { %254 = vst.msk [vmem:[%s457_s8] sm:$0x3] %vm253_vm3, %v252_v2 }

</bundles_post_ra>
